<compile_context>
chip_gen: v6e
topology: v6e:2x2x1
jax: 0.10.0
libtpu: 0.0.40
codegen_flags: <defaults>
</compile_context>

<pallas_src>
import jax
import jax.numpy as jnp
from jax.experimental import pallas as pl
from jax.experimental.pallas import tpu as pltpu


def _ft_map_basic_kernel(xs_ref, y_ref, out_ref):
    # Mapped elementwise body f(x, y) = x + y applied to every row of the xs
    # tile (y broadcasts over the mapped/sublane axis), then + xs.
    xs = xs_ref[...]                 # (TM, TD)
    y = y_ref[...]                   # (1, TD) -> broadcasts over rows
    out_ref[...] = (xs + y) + xs     # map(f, xs, y) + xs


def _round_up(x: int, m: int) -> int:
    return ((x + m - 1) // m) * m


def ft_map_basic(xs: jax.Array, y: jax.Array, *, max_tm: int = 512,
                 max_td: int = 1024) -> jax.Array:
    """xs: (N, D), y: (D,) -> (N, D), matching FTMapBasic.forward."""
    n, d = xs.shape
    assert y.shape == (d,)
    y = y.astype(xs.dtype)

    # Sublane granule depends on dtype packing (f32: 8, bf16: 16, int8: 32).
    itemsize = jnp.dtype(xs.dtype).itemsize
    sub = 8 * max(1, 4 // itemsize)

    # Lane-dense, evenly-divided tiles: 512 x 1024 f32 (~2 MiB) fits every
    # generation's scoped-VMEM default with double buffering; clip down for
    # small inputs.
    td = min(max_td, _round_up(d, 128))
    tm = min(max_tm, _round_up(n, sub))
    n_pad = _round_up(n, tm)
    d_pad = _round_up(d, td)

    xs_p = jnp.pad(xs, ((0, n_pad - n), (0, d_pad - d)))
    y_p = jnp.pad(y, (0, d_pad - d)).reshape(1, d_pad)

    grid = (n_pad // tm, d_pad // td)

    out = pl.pallas_call(
        _ft_map_basic_kernel,
        out_shape=jax.ShapeDtypeStruct((n_pad, d_pad), xs.dtype),
        grid=grid,
        in_specs=[
            pl.BlockSpec((tm, td), lambda i, j: (i, j)),
            pl.BlockSpec((1, td), lambda i, j: (0, j)),  # y: resident per col-tile
        ],
        out_specs=pl.BlockSpec((tm, td), lambda i, j: (i, j)),
        input_output_aliases={0: 0},  # padded xs copy is dead after the call
        compiler_params=pltpu.CompilerParams(
            dimension_semantics=("parallel", "parallel")),
    )(xs_p, y_p)

    return out[:n, :d]


if __name__ == "__main__":
    key = jax.random.PRNGKey(0)
    kx, ky = jax.random.split(key)
    # Shapes implied by get_random_inputs(): xs (2, 4), y (4,)
    xs = jax.random.uniform(kx, (2, 4), dtype=jnp.float32)
    y = jax.random.uniform(ky, (4,), dtype=jnp.float32)

    out = ft_map_basic(xs, y)
    out = jax.block_until_ready(out)

    # Reference check against pure-JAX semantics of the module.
    ref = (xs + y[None, :]) + xs
    assert out.shape == (2, 4)
    assert jnp.allclose(out, ref, atol=1e-6, rtol=1e-6)

    print("KERNEL_OK")
</pallas_src>

<mosaic_0001>
module attributes {stable_mosaic.version = 11 : i64} {
  func.func @_ft_map_basic_kernel(%arg0: i32, %arg1: i32, %arg2: memref<8x128xf32, #tpu.memory_space<vmem>>, %arg3: memref<1x128xf32, #tpu.memory_space<vmem>>, %arg4: memref<8x128xf32, #tpu.memory_space<vmem>>) attributes {dimension_semantics = [#tpu.dimension_semantics<parallel>, #tpu.dimension_semantics<parallel>], iteration_bounds = array<i64: 1, 1>, scalar_prefetch = 0 : i64, scratch_operands = 0 : i64, tpu.core_type = #tpu.core_type<tc>, window_params = [{transform_indices = @transform_0, window_bounds = array<i64: 8, 128>}, {transform_indices = @transform_1, window_bounds = array<i64: 1, 128>}, {transform_indices = @transform_2, window_bounds = array<i64: 8, 128>}]} {
    %c0 = arith.constant 0 : index
    %c0_0 = arith.constant 0 : index
    %0 = vector.load %arg2[%c0, %c0_0] : memref<8x128xf32, #tpu.memory_space<vmem>>, vector<8x128xf32>
    %c0_1 = arith.constant 0 : index
    %c0_2 = arith.constant 0 : index
    %1 = vector.load %arg3[%c0_1, %c0_2] : memref<1x128xf32, #tpu.memory_space<vmem>>, vector<1x128xf32>
    %2 = vector.broadcast %1 : vector<1x128xf32> to vector<8x128xf32>
    %3 = arith.addf %0, %2 : vector<8x128xf32>
    %4 = arith.addf %3, %0 : vector<8x128xf32>
    %c0_3 = arith.constant 0 : index
    %c0_4 = arith.constant 0 : index
    %5 = vector.load %arg4[%c0_3, %c0_4] : memref<8x128xf32, #tpu.memory_space<vmem>>, vector<8x128xf32>
    tpu.vector_store %arg4[%c0_3, %c0_4], %4 {strides = array<i32>} : memref<8x128xf32, #tpu.memory_space<vmem>>, vector<8x128xf32>,
    return
  }
  func.func @transform_0(%arg0: i32, %arg1: i32) -> (i32, i32) {
    %c0_i32 = arith.constant 0 : i32
    return %arg0, %arg1 : i32, i32
  }
  func.func @transform_1(%arg0: i32, %arg1: i32) -> (i32, i32) {
    %c0_i32 = arith.constant 0 : i32
    %c0_i32_0 = arith.constant 0 : i32
    return %c0_i32, %arg1 : i32, i32
  }
  func.func @transform_2(%arg0: i32, %arg1: i32) -> (i32, i32) {
    %c0_i32 = arith.constant 0 : i32
    return %arg0, %arg1 : i32, i32
  }
}

</mosaic_0001>

<bundles_post_ra>
// kernel: tpu_custom_call.1
= control target key start
LH: loop header
LB: loop body
LE: loop exit
PB: predicated region body
PF: predicated region fallthrough
CT: control target
= control target key end

     0   :  { %7 = vsyncpa [#allocation3], 0  ;;  %s123_s0 = inlined_call_operand.hbm [shape: f32[8,128], index: 0, kind: input, shape index: {}, may-alias: {0,2}]   ;;  %s124_s1 = inlined_call_operand.vmem [shape: f32[1,128], index: 1, kind: input, shape index: {}]   ;;  %s125_s2 = inlined_call_operand.hbm [shape: f32[8,128], index: 2, kind: output, shape index: {}, may-alias: {0,2}]  }
   0x1   :  { %8 = vsyncpa [#allocation4], 0  ;;  %s97_s9 = smov [#allocation2]  }
   0x2   :  { %s15_s10 = sshll.u32 %s97_s9, 4  ;;  %s16_s10 = int_to_ptr.vmem [resolvable:$true] %s15_s10 }
   0x3   :  { %s61_s11 = scalar_lea.vmem %s16_s10, 128  ;;  %p66_p1 = scmp.lt.s32.totalorder %s16_s10, %s16_s10 }
   0x4   :  { %p62_p0 = scmp.ne.s32.totalorder %s16_s10, %s61_s11  ;;  %p67_p2 = scmp.lt.s32.totalorder %s61_s11, %s61_s11 }
   0x6   :  { %p68_p3 = por %p67_p2, %p66_p1 }
   0x8   :  { %p69_p4 = pnand %p68_p3, %p62_p0 }
   0xa   :  { %72 = shalt.err (!%p69_p4)
}
   0xb   :  { %18 = dma.hbm_to_vmem [thread:$0]  %s123_s0, 128, %s16_s10, [#allocation3]  }
   0xc   :  { %93 = dma.done.wait [#allocation3], 128  }
   0xd   :  { %94 = vsyncadd [#allocation3], 4294967168  ;;  %v24_v0 = vld [vmem:[#allocation2] sm:$0xff]  ;;  %s98_s16 = smov [#allocation5]  }
   0xe   :  { %v50_v1 = vld [vmem:[%s124_s1] ss:$0 sm:$0xff]  ;;  %s41_s17 = sshll.u32 %s98_s16, 4  ;;  %s42_s17 = int_to_ptr.vmem [resolvable:$true] %s41_s17 }
   0xf   :  { %v32_v2 = vadd.f32 %v50_v1, %v24_v0  ;;  %s73_s18 = scalar_lea.vmem %s42_s17, 128  ;;  %p78_p6 = scmp.lt.s32.totalorder %s42_s17, %s42_s17 }
  0x10   :  { %p74_p5 = scmp.ne.s32.totalorder %s42_s17, %s73_s18  ;;  %p79_p7 = scmp.lt.s32.totalorder %s73_s18, %s73_s18 }
  0x11   :  { %v33_v3 = vadd.f32 %v32_v2, %v24_v0 }
  0x12   :  { %p80_p8 = por %p79_p7, %p78_p6 }
  0x13   :  { %34 = vst [vmem:[#allocation5] sm:$0xff] %v33_v3 }
  0x14   :  { %p81_p9 = pnand %p80_p8, %p74_p5 }
  0x16   :  { %84 = shalt.err (!%p81_p9)
}
  0x17   :  { %44 = dma.vmem_to_hbm [thread:$0]  %s42_s17, 128, %s125_s2, [#allocation4]  }
  0x18   :  { %95 = dma.done.wait [#allocation4], 128  }
  0x19   :  { %96 = vsyncadd [#allocation4], 4294967168 }
  0x1a   :  { %48 = vsyncpa [#allocation3], 1 }
  0x1b   :  { %49 = vsyncpa [#allocation4], 1 }

</bundles_post_ra>
